<compile_context>
chip_gen: v7x
topology: tpu7x:2x2x1
jax: 0.10.0
libtpu: 0.0.40
codegen_flags: <defaults>
</compile_context>

<pallas_src>
from functools import partial

import numpy as np
import jax
import jax.numpy as jnp
from jax import lax
from jax.experimental import pallas as pl
from jax.experimental.pallas import tpu as pltpu

# ---- module hyper-parameters (args) -----------------------------------------
IN_PLANES = 4        # in_planes
OUT_PLANES = 8       # out_planes
KSIZE = 3            # kernel_size (padding=1 -> 'same')
NF = 16              # args.num_feat_fusion
NUM_PARAMS = 8       # args.num_params
NEXPERT = 5          # K == args.num_network
MLP_HIDDEN = 15
LEAK = 0.2           # LeakyReLU negative slope

# Tap order: the 9 inner 3x3 offsets first (row-major), then the 16 outer 5x5
# offsets.  The dynamic 3x3 conv reuses slab rows [0 : 9*Cin).
_ORDER5 = ([(dh, dw) for dh in (-1, 0, 1) for dw in (-1, 0, 1)] +
           [(dh, dw) for dh in (-2, -1, 0, 1, 2) for dw in (-2, -1, 0, 1, 2)
            if abs(dh) > 1 or abs(dw) > 1])


def _leaky(x):
    return jnp.where(x > 0, x, LEAK * x)


# ---- pltpu.roll convention probe (resolved eagerly at BUILD time, never in jit) ----
_ROLL_MATCHES_JNP = None


def _roll_matches_jnp_roll():
    global _ROLL_MATCHES_JNP
    if _ROLL_MATCHES_JNP is None:
        def k(x_ref, o_ref):
            o_ref[...] = pltpu.roll(x_ref[...], 1, axis=1)

        x = jnp.broadcast_to(jnp.arange(256, dtype=jnp.float32), (8, 256))
        y = pl.pallas_call(
            k, out_shape=jax.ShapeDtypeStruct((8, 256), jnp.float32))(x)
        # jnp.roll semantics => out[0,0] == in[0,255] == 255 ; otherwise out[0,0] == 1.
        _ROLL_MATCHES_JNP = bool(float(jax.device_get(y[0, 0])) > 128.0)
    return _ROLL_MATCHES_JNP


# ---- tap tables (shifts + boundary masks), numpy, build time --------------------

def _tap_tables(H, W):
    hh = np.arange(H).reshape(H, 1)
    ww = np.arange(W).reshape(1, W)
    shifts, masks = [], []
    for dh, dw in _ORDER5:
        shifts.append(dh * W + dw)
        valid = ((hh + dh >= 0) & (hh + dh < H) &
                 (ww + dw >= 0) & (ww + dw < W))
        masks.append(valid.astype(np.float32).reshape(H * W))
    return shifts, np.stack(masks, axis=0)            # (25, H*W)


# ---- the single fused Pallas kernel ----------------------------------------------

def _fused_kernel(x_ref, m_ref,
                  w1_ref, b1_ref, w2_ref, b2_ref, w3_ref, b3_ref,
                  mw1_ref, mb1_ref, mw2_ref, mb2_ref,
                  dw_ref, db_ref,
                  out_ref, attn_ref,
                  slab1_ref, slab2_ref,
                  *, amounts, bt, hw):
    cin = x_ref.shape[1]
    nf = w2_ref.shape[0]
    n_exp, cout = dw_ref.shape[0], dw_ref.shape[1]

    def fill_slab(slab_ref, feat, cf):
        # In-kernel im2col: 25 shifted+masked taps of `feat`, stacked along the
        # contraction (sublane) axis so the conv is ONE MXU matmul.  The mask
        # zeroes lanes whose source fell outside (H, W) — including every lane
        # where the roll crosses a sample boundary within the Bt*HW lane axis.
        for t, a in enumerate(amounts):
            rows = slice(t * cf, (t + 1) * cf)
            if a == 0:
                slab_ref[rows, :] = feat               # centre tap, mask == 1
            else:
                slab_ref[rows, :] = pltpu.roll(feat, a, axis=1) * m_ref[t:t + 1, :]

    def conv(slab_ref, w_ref, b_ref):
        return jnp.dot(w_ref[...], slab_ref[...],
                       preferred_element_type=jnp.float32) + b_ref[...]

    x0 = x_ref[0]                                      # (Cin, Bt*HW), lane-dense

    # ---- Fusion.ConvNet: 3x (conv5x5 + bias + LeakyReLU), one matmul each --------
    fill_slab(slab1_ref, x0, cin)                      # x taps: reused by 3x3 below
    h = _leaky(conv(slab1_ref, w1_ref, b1_ref))        # (NF, N)
    fill_slab(slab2_ref, h, nf)
    h = _leaky(conv(slab2_ref, w2_ref, b2_ref))        # (NF, N)
    fill_slab(slab2_ref, h, nf)                        # slab2 reused in place
    h = _leaky(conv(slab2_ref, w3_ref, b3_ref))        # (NUM_PARAMS, N)

    # ---- per-sample global average pool (segmented lane reduction) ---------------
    pooled = [jnp.mean(h[:, b * hw:(b + 1) * hw], axis=1, keepdims=True)
              for b in range(bt)]                      # bt x (NUM_PARAMS, 1)

    lane_b = lax.broadcasted_iota(jnp.int32, (1, bt), 1)
    attn_out = jnp.zeros((n_exp, bt), jnp.float32)

    # ---- per-sample MappingNet + softmax + expert aggregation + dynamic 3x3 conv --
    for b in range(bt):
        z1 = _leaky(jnp.dot(mw1_ref[...], pooled[b],
                            preferred_element_type=jnp.float32) + mb1_ref[...])  # (15,1)
        z2 = jnp.dot(mw2_ref[...], z1,
                     preferred_element_type=jnp.float32) + mb2_ref[...]          # (K,1)
        z2 = z2 - jnp.max(z2, axis=0, keepdims=True)
        e = jnp.exp(z2)
        attn = e / jnp.sum(e, axis=0, keepdims=True)                              # (K,1)
        attn_out = attn_out + jnp.where(lane_b == b, attn, 0.0)

        # expert aggregation: tiny VALU loop over K experts
        agg_w = attn[0:1, 0:1] * dw_ref[0]             # (Cout, 9*Cin)
        agg_b = attn[0:1, 0:1] * db_ref[0]             # (Cout, 1)
        for k in range(1, n_exp):
            s = attn[k:k + 1, 0:1]
            agg_w = agg_w + s * dw_ref[k]
            agg_b = agg_b + s * db_ref[k]

        # dynamic 3x3 conv: reuse the inner-9 taps of the x slab (identical masks),
        # one (Cout, 9*Cin) @ (9*Cin, HW) matmul per sample.
        y = jnp.dot(agg_w, slab1_ref[0:9 * cin, b * hw:(b + 1) * hw],
                    preferred_element_type=jnp.float32) + agg_b
        out_ref[0, :, b * hw:(b + 1) * hw] = y         # 128-aligned unmasked store

    attn_ref[0] = attn_out


# ---- builder + wrapper -------------------------------------------------------------

def make_dynamic_conv2d_forward(H, W, samples_per_block=2):
    """Build a jit-able forward for a fixed spatial size.

    Resolves the pltpu.roll rotation direction and the tap tables eagerly here
    (outside any jit), per the correctness review.
    """
    HW = H * W
    jnp_like = _roll_matches_jnp_roll()
    shifts, masks_np = _tap_tables(H, W)               # (25,), (25, HW)

    def forward(x, p):
        B, C, _, _ = x.shape
        bt = samples_per_block if (B % samples_per_block == 0) else 1
        nb = B // bt
        N = bt * HW

        def amount(s):                   # roll amount so that tap[i] = x[i + s]
            if s == 0:
                return 0
            return (-s) % N if jnp_like else s % N
        amounts = tuple(amount(s) for s in shifts)

        masks = jnp.asarray(np.tile(masks_np, (1, bt)))        # (25, N)

        nf = p["cw1"].shape[0]
        npar = p["cw3"].shape[0]
        n_exp, cout = p["dw"].shape[0], p["dw"].shape[1]
        nh = p["mw1"].shape[1]

        # lane-dense input: (nb, C, Bt*HW), sample b of a block on lanes [b*HW,(b+1)*HW)
        xb = x.reshape(nb, bt, C, HW).transpose(0, 2, 1, 3).reshape(nb, C, N)

        def pack5(w):    # (Cout, Cin, 5, 5) -> (Cout, 25*Cin), taps in _ORDER5 order
            cols = [w[:, :, dh + 2, dw + 2] for dh, dw in _ORDER5]
            return jnp.concatenate(cols, axis=1)

        w1, w2, w3 = pack5(p["cw1"]), pack5(p["cw2"]), pack5(p["cw3"])
        b1 = p["cb1"].reshape(nf, 1)
        b2 = p["cb2"].reshape(nf, 1)
        b3 = p["cb3"].reshape(npar, 1)
        mw1 = p["mw1"].T                                        # (15, num_params)
        mb1 = p["mb1"].reshape(nh, 1)
        mw2 = p["mw2"].T                                        # (K, 15)
        mb2 = p["mb2"].reshape(n_exp, 1)
        # expert weights: (K, Cout, 9*Cin), taps ordered like the first 9 slab taps
        dcols = [p["dw"][:, :, :, dh + 1, dw + 1] for dh, dw in _ORDER5[:9]]
        dwp = jnp.concatenate(dcols, axis=2)                    # (K, Cout, 9*Cin)
        dbp = p["db"].reshape(n_exp, cout, 1)

        kern = partial(_fused_kernel, amounts=amounts, bt=bt, hw=HW)

        def rep(a):
            return pl.BlockSpec(a.shape, lambda b, _nd=a.ndim: (0,) * _nd)

        out_b, attn_b = pl.pallas_call(
            kern,
            grid=(nb,),
            in_specs=[
                pl.BlockSpec((1, C, N), lambda b: (b, 0, 0)),
                rep(masks),
                rep(w1), rep(b1), rep(w2), rep(b2), rep(w3), rep(b3),
                rep(mw1), rep(mb1), rep(mw2), rep(mb2),
                rep(dwp), rep(dbp),
            ],
            out_specs=(
                pl.BlockSpec((1, cout, N), lambda b: (b, 0, 0)),
                pl.BlockSpec((1, n_exp, bt), lambda b: (b, 0, 0)),
            ),
            out_shape=(
                jax.ShapeDtypeStruct((nb, cout, N), jnp.float32),
                jax.ShapeDtypeStruct((nb, n_exp, bt), jnp.float32),
            ),
            scratch_shapes=[
                pltpu.VMEM((25 * C, N), jnp.float32),     # x tap slab (reused for 3x3)
                pltpu.VMEM((25 * nf, N), jnp.float32),    # hidden tap slab (layers 2&3)
            ],
            compiler_params=pltpu.CompilerParams(dimension_semantics=("parallel",)),
        )(xb, masks, w1, b1, w2, b2, w3, b3, mw1, mb1, mw2, mb2, dwp, dbp)

        out = (out_b.reshape(nb, cout, bt, HW).transpose(0, 2, 1, 3)
               .reshape(B, cout, H, W))
        attn = attn_b.transpose(0, 2, 1).reshape(B, n_exp)
        return out, attn

    return forward


# ---- deterministic parameter init ---------------------------------------------------

def init_params(key):
    ks = jax.random.split(key, 12)

    def n(k, shape, s):
        return s * jax.random.normal(k, shape, jnp.float32)

    p = {}
    p["cw1"] = n(ks[0], (NF, IN_PLANES, 5, 5), 0.08)
    p["cb1"] = n(ks[1], (NF,), 0.05)
    p["cw2"] = n(ks[2], (NF, NF, 5, 5), 0.04)
    p["cb2"] = n(ks[3], (NF,), 0.05)
    p["cw3"] = n(ks[4], (NUM_PARAMS, NF, 5, 5), 0.04)
    p["cb3"] = n(ks[5], (NUM_PARAMS,), 0.05)
    p["mw1"] = n(ks[6], (NUM_PARAMS, MLP_HIDDEN), 0.3)
    p["mb1"] = n(ks[7], (MLP_HIDDEN,), 0.05)
    p["mw2"] = n(ks[8], (MLP_HIDDEN, NEXPERT), 0.3)
    p["mb2"] = n(ks[9], (NEXPERT,), 0.05)
    p["dw"] = n(ks[10], (NEXPERT, OUT_PLANES, IN_PLANES, KSIZE, KSIZE), 0.15)
    p["db"] = n(ks[11], (NEXPERT, OUT_PLANES), 0.05)
    return p


# ---- pure-JAX reference (for sanity check) -------------------------------------------

def _conv_ref(x, w, b, pad):
    y = lax.conv_general_dilated(x, w, window_strides=(1, 1),
                                 padding=[(pad, pad), (pad, pad)],
                                 dimension_numbers=("NCHW", "OIHW", "NCHW"))
    return y + b[None, :, None, None]


def forward_ref(x, p):
    h = _leaky(_conv_ref(x, p["cw1"], p["cb1"], 2))
    h = _leaky(_conv_ref(h, p["cw2"], p["cb2"], 2))
    h = _leaky(_conv_ref(h, p["cw3"], p["cb3"], 2))
    out_params = h.mean(axis=(2, 3))
    m = _leaky(out_params @ p["mw1"] + p["mb1"])
    attn = jax.nn.softmax(m @ p["mw2"] + p["mb2"], axis=1)
    agg_w = jnp.einsum("bk,koihw->boihw", attn, p["dw"])
    agg_b = attn @ p["db"]
    pad = (KSIZE - 1) // 2
    outs = []
    for bi in range(x.shape[0]):
        y = lax.conv_general_dilated(x[bi:bi + 1], agg_w[bi], (1, 1),
                                     [(pad, pad), (pad, pad)],
                                     dimension_numbers=("NCHW", "OIHW", "NCHW"))
        outs.append(y + agg_b[bi][None, :, None, None])
    return jnp.concatenate(outs, 0), attn


# ---- main -----------------------------------------------------------------------------

if __name__ == "__main__":
    # B=4, Bt=2 -> grid=(2,): two samples per step (amortizes per-step overhead on
    # v5e/v6e) and an even, >=2-step parallel grid for v7x's two TensorCores.
    B, H, W = 4, 16, 16
    key = jax.random.PRNGKey(0)
    kx, kp = jax.random.split(key)
    x = jax.random.normal(kx, (B, IN_PLANES, H, W), jnp.float32)
    params = init_params(kp)

    forward = make_dynamic_conv2d_forward(H, W, samples_per_block=2)  # outside jit
    fwd = jax.jit(forward)
    out, attn = fwd(x, params)
    out = jax.block_until_ready(out)
    attn = jax.block_until_ready(attn)

    assert out.shape == (B, OUT_PLANES, H, W)
    assert attn.shape == (B, NEXPERT)

    ref_out, ref_attn = forward_ref(x, params)
    assert float(jnp.max(jnp.abs(attn - ref_attn))) < 1e-2
    assert float(jnp.max(jnp.abs(out - ref_out))) < 5e-2

    print("KERNEL_OK")
</pallas_src>

<mosaic_0001>
module attributes {stable_mosaic.version = 11 : i64} {
  func.func @k(%arg0: memref<8x256xf32, #tpu.memory_space<vmem>>, %arg1: memref<8x256xf32, #tpu.memory_space<vmem>>) attributes {dimension_semantics = [], scalar_prefetch = 0 : i64, scratch_operands = 0 : i64, tpu.core_type = #tpu.core_type<tc>} {
    %c0 = arith.constant 0 : index
    %c0_0 = arith.constant 0 : index
    %0 = vector.load %arg0[%c0, %c0_0] : memref<8x256xf32, #tpu.memory_space<vmem>>, vector<8x256xf32>
    %c1_i32 = arith.constant 1 : i32
    %1 = tpu.dynamic_rotate %0 by %c1_i32 dim 1 : vector<8x256xf32>, i32 -> vector<8x256xf32>
    %c0_1 = arith.constant 0 : index
    %c0_2 = arith.constant 0 : index
    %2 = vector.load %arg1[%c0_1, %c0_2] : memref<8x256xf32, #tpu.memory_space<vmem>>, vector<8x256xf32>
    tpu.vector_store %arg1[%c0_1, %c0_2], %1 {strides = array<i32>} : memref<8x256xf32, #tpu.memory_space<vmem>>, vector<8x256xf32>,
    return
  }
}

</mosaic_0001>

<bundles_post_ra>
// kernel: tpu_custom_call.1
= control target key start
LH: loop header
LB: loop body
LE: loop exit
PB: predicated region body
PF: predicated region fallthrough
CT: control target
= control target key end

     0   :  { %6 = vsyncpa [#allocation3], 0  ;;  %s137_s0 = inlined_call_operand.hbm [shape: f32[8,256], index: 0, kind: input, shape index: {}]   ;;  %s138_s1 = inlined_call_operand.hbm [shape: f32[8,256], index: 1, kind: output, shape index: {}]  }
   0x1   :  { %7 = vsyncpa [#allocation4], 0  ;;  %s100_s6 = smov [#allocation2]   ;;  %s52_s10 = scalar_lea.hbm %s137_s0, 256 }
   0x2   :  { %s14_s7 = sshll.u32 %s100_s6, 4  ;;  %p53_p0 = scmp.ne.s32.totalorder %s137_s0, %s52_s10  ;;  %s15_s7 = int_to_ptr.vmem [resolvable:$true] %s14_s7 }
   0x3   :  { %p56_p1 = scmp.lt.u32.totalorder %s52_s10, %s137_s0 }
   0x5   :  { %p58_p2 = pnand %p56_p1, %p53_p0 }
   0x7   :  { %61 = shalt.err (!%p58_p2)
}
   0x8   :  { %s62_s15 = scalar_lea.vmem %s15_s7, 256  ;;  %p67_p4 = scmp.lt.s32.totalorder %s15_s7, %s15_s7 }
   0x9   :  { %p63_p3 = scmp.ne.s32.totalorder %s15_s7, %s62_s15  ;;  %p68_p5 = scmp.lt.s32.totalorder %s62_s15, %s62_s15 }
   0xb   :  { %p69_p6 = por %p68_p5, %p67_p4 }
   0xd   :  { %p70_p7 = pnand %p69_p6, %p63_p3 }
   0xf   :  { %73 = shalt.err (!%p70_p7)
}
  0x10   :  { %17 = dma.hbm_to_vmem [thread:$0]  %s137_s0, 256, %s15_s7, [#allocation3]  }
  0x11   :  { %96 = dma.done.wait [#allocation3], 256  }
  0x12   :  { %97 = vsyncadd [#allocation3], 4294967040  ;;  %v21_v0 = vld [vmem:[#allocation2] sm:$0xff]  ;;  %s101_s18 = smov 1   ;;  %v22_v1 = vld [vmem:[#allocation2 + $0x8] sm:$0xff]  ;;  %v27_v2 = vlaneseq  ;;  %s102_s19 = smov [#allocation5]  }
  0x13   :  { %23 = vrot.lane.b32.xlu0 %v21_v0, %s101_s18  ;;  %s40_s20 = sshll.u32 %s102_s19, 4  ;;  %s41_s20 = int_to_ptr.vmem [resolvable:$true] %s40_s20 }
  0x14   :  { %v28_v3 = vand.u32 127, %v27_v2  ;;  %s74_s0 = scalar_lea.vmem %s41_s20, 256  ;;  %p79_p9 = scmp.lt.s32.totalorder %s41_s20, %s41_s20 }
  0x15   :  { %p75_p8 = scmp.ne.s32.totalorder %s41_s20, %s74_s0  ;;  %p80_p10 = scmp.lt.s32.totalorder %s74_s0, %s74_s0 }
  0x16   :  { %vm29_vm0 = vcmp.lt.s32.totalorder %v28_v3, 1 }
  0x17   :  { %25 = vrot.lane.b32.xlu0 %v22_v1, %s101_s18  ;;  %p81_p11 = por %p80_p10, %p79_p9 }
  0x19   :  { %p82_p12 = pnand %p81_p11, %p75_p8 }
  0x85   :  { %v24_v4 = vpop.permute.xlu0 %23 }
  0x89   :  { %v26_v5 = vpop.permute.xlu0 %25 }
  0x8a   :  { %v30_v6 = vsel %vm29_vm0, %v24_v4, %v26_v5  ;;  %v31_v7 = vsel %vm29_vm0, %v26_v5, %v24_v4 }
  0x8b   :  { %32 = vst [vmem:[#allocation5] sm:$0xff] %v31_v7  ;;  %33 = vst [vmem:[#allocation5 + $0x8] sm:$0xff] %v30_v6 }
  0x8c   :  { %85 = shalt.err (!%p82_p12)
}
  0x8d   :  { %s86_s23 = scalar_lea.hbm %s138_s1, 256 }
  0x8e   :  { %p87_p13 = scmp.ne.s32.totalorder %s138_s1, %s86_s23  ;;  %p90_p0 = scmp.lt.u32.totalorder %s86_s23, %s138_s1 }
  0x90   :  { %p92_p1 = pnand %p90_p0, %p87_p13 }
  0x92   :  { %95 = shalt.err (!%p92_p1)
}
  0x93   :  { %43 = dma.vmem_to_hbm [thread:$0]  %s41_s20, 256, %s138_s1, [#allocation4]  }
  0x94   :  { %98 = dma.done.wait [#allocation4], 256  }
  0x95   :  { %99 = vsyncadd [#allocation4], 4294967040 }
  0x96   :  { %47 = vsyncpa [#allocation3], 1 }
  0x97   :  { %48 = vsyncpa [#allocation4], 1 }

</bundles_post_ra>
